<compile_context>
chip_gen: v7x
topology: tpu7x:2x2x1
jax: 0.10.0
libtpu: 0.0.40
codegen_flags: <defaults>
</compile_context>

<pallas_src>
import numpy as np
import jax
import jax.numpy as jnp
from jax.experimental import pallas as pl
from jax.experimental.pallas import tpu as pltpu


def _graph_prompt_kernel(c_ref, x_ref, w_ref, b_ref, o_ref, acc_ref, csum_ref):
    # c_ref:    (bsz, tn)   coefficients: prompt_weight[pos]/max_size, 0 outside graph
    # x_ref:    (tn, Din)   node-feature tile (flat node axis, zero padded)
    # w_ref:    (Din, Dout) linear weight (input_dim, output_dim), f32, resident
    # b_ref:    (1, Dout)   linear bias, f32, resident
    # o_ref:    (bsz, Dout) result (resident across the node-reduction axis)
    # acc_ref:  (bsz, Din)  f32 accumulator for C @ X
    # csum_ref: (bsz, 1)    f32 accumulator for rowsum(C) (scales the bias)
    k = pl.program_id(0)

    @pl.when(k == 0)
    def _():
        acc_ref[...] = jnp.zeros_like(acc_ref)
        csum_ref[...] = jnp.zeros_like(csum_ref)

    c = c_ref[...]
    # weighted per-graph node sum, reduced BEFORE the linear layer (MXU matmul)
    acc_ref[...] += jnp.dot(c, x_ref[...], preferred_element_type=jnp.float32)
    # coefficient row-sums (XLU lane reduce -> separate slot, effectively free)
    csum_ref[...] += jnp.sum(c.astype(jnp.float32), axis=1, keepdims=True)

    @pl.when(k == pl.num_programs(0) - 1)
    def _():
        y = jnp.dot(acc_ref[...], w_ref[...],
                    preferred_element_type=jnp.float32)       # (bsz, Dout)
        y = y + csum_ref[...] * b_ref[...]                    # rank-1 bias term
        o_ref[...] = y.astype(o_ref.dtype)


def graph_prompt_layer_weighted_linear(x, graph_len, prompt_weight, lin_w, lin_b):
    """x: (total_nodes, input_dim); graph_len: host int array (bsz,).

    lin_w is stored as (input_dim, output_dim), i.e. transposed relative to
    torch.nn.Linear.weight, so y = x @ W + b.
    """
    graph_len = np.asarray(graph_len)
    bsz = int(graph_len.shape[0])
    max_size = int(graph_len.max())
    N, din = x.shape
    dout = lin_w.shape[-1]

    # Stream X / C in bf16 when the input is bf16 (halves HBM traffic on
    # v6e/v7x); W, bias and all accumulation stay f32.
    compute_dtype = jnp.bfloat16 if x.dtype == jnp.bfloat16 else jnp.float32

    # ---- trace-time index computation (vectorized, no per-graph Python loop) ----
    offsets = np.concatenate([np.zeros(1, np.int64), np.cumsum(graph_len)[:-1]])
    graph_id = np.repeat(np.arange(bsz), graph_len)           # graph of each node
    pos = (np.arange(N) - offsets[graph_id]).astype(np.int32) # position in its graph

    # ---- node-axis tiling (reduction axis of the kernel grid) ----
    # Big tiles amortize the ~0.35us/step grid overhead; cap the X tile at ~2MiB
    # so double-buffering stays far below the scoped-VMEM limit even for wide Din.
    itemsize = jnp.dtype(compute_dtype).itemsize
    tn_cap = int(min(4096, max(512, ((2 << 20) // max(1, din * itemsize)) // 128 * 128)))
    if N <= tn_cap:
        tn = max(8, ((N + 7) // 8) * 8)
        n_pad = tn                                            # single tile
    else:
        tn = tn_cap
        n_pad = ((N + tn - 1) // tn) * tn
    grid_k = n_pad // tn

    # coef[b, n] = prompt_weight[0, pos(n)] / max_size  if node n in graph b else 0
    coef_flat = prompt_weight[0, jnp.asarray(pos)].astype(jnp.float32)
    coef_flat = coef_flat * (1.0 / float(max_size))
    coef = jnp.zeros((bsz, n_pad), jnp.float32).at[
        jnp.asarray(graph_id, jnp.int32), jnp.arange(N)].set(coef_flat)
    coef = coef.astype(compute_dtype)

    x_c = x.astype(compute_dtype)
    if n_pad != N:
        x_c = jnp.pad(x_c, ((0, n_pad - N), (0, 0)))          # coef is 0 on pad rows

    out = pl.pallas_call(
        _graph_prompt_kernel,
        out_shape=jax.ShapeDtypeStruct((bsz, dout), x.dtype),
        grid=(grid_k,),
        in_specs=[
            pl.BlockSpec((bsz, tn), lambda k: (0, k)),         # coef tile
            pl.BlockSpec((tn, din), lambda k: (k, 0)),         # node-feature tile
            pl.BlockSpec((din, dout), lambda k: (0, 0)),       # W (resident)
            pl.BlockSpec((1, dout), lambda k: (0, 0)),         # bias (resident)
        ],
        out_specs=pl.BlockSpec((bsz, dout), lambda k: (0, 0)),
        scratch_shapes=[pltpu.VMEM((bsz, din), jnp.float32),   # C @ X accumulator
                        pltpu.VMEM((bsz, 1), jnp.float32)],    # rowsum(C) accumulator
        compiler_params=pltpu.CompilerParams(
            dimension_semantics=("arbitrary",)),               # node axis = reduction
    )(coef, x_c, lin_w.astype(jnp.float32),
      lin_b.reshape(1, dout).astype(jnp.float32))

    return out                                                 # (bsz, Dout), x.dtype


def _reference(x, graph_len, prompt_weight, lin_w, lin_b):
    """Pure-JAX reproduction of the PyTorch forward for verification."""
    graph_len = np.asarray(graph_len)
    max_size = int(graph_len.max())
    dout = lin_w.shape[-1]
    y = x @ lin_w + lin_b                                      # linear first
    segments, off = [], 0
    for l in graph_len.tolist():
        g = y[off:off + l]
        off += l
        if l < max_size:
            g = jnp.concatenate([g, jnp.zeros((max_size - l, dout), y.dtype)], axis=0)
        elif l > max_size:
            g = g[:max_size]
        segments.append(g)
    ge = jnp.stack(segments, axis=0)                           # (bsz, S, Dout)
    w = prompt_weight[0, :max_size]
    ge = ge * w[None, :, None]
    return ge.mean(axis=1)


if __name__ == "__main__":
    # module config
    max_n_num = 8
    input_dim = 16
    output_dim = 32
    # example graphs: 2 graphs with 8 and 6 nodes (total 14 nodes)
    graph_len = np.array([8, 6], dtype=np.int32)
    total_nodes = int(graph_len.sum())

    key = jax.random.PRNGKey(0)
    k_x, k_pw, k_w, k_b = jax.random.split(key, 4)

    # deterministic parameter init (shapes from __init__)
    # self.weight: (1, max_n_num), xavier_uniform
    bound_pw = float(np.sqrt(6.0 / (1 + max_n_num)))
    prompt_weight = jax.random.uniform(
        k_pw, (1, max_n_num), jnp.float32, -bound_pw, bound_pw)
    # nn.Linear(input_dim, output_dim) -> W stored transposed: (input_dim, output_dim)
    bound_l = float(1.0 / np.sqrt(input_dim))
    lin_w = jax.random.uniform(
        k_w, (input_dim, output_dim), jnp.float32, -bound_l, bound_l)
    lin_b = jax.random.uniform(
        k_b, (output_dim,), jnp.float32, -bound_l, bound_l)

    # input node features
    x = jax.random.normal(k_x, (total_nodes, input_dim), jnp.float32)

    out = graph_prompt_layer_weighted_linear(x, graph_len, prompt_weight, lin_w, lin_b)
    out = jax.block_until_ready(out)

    ref = jax.block_until_ready(_reference(x, graph_len, prompt_weight, lin_w, lin_b))
    np.testing.assert_allclose(np.asarray(out), np.asarray(ref), rtol=1e-4, atol=1e-5)

    print("KERNEL_OK")
</pallas_src>

<mosaic_0001>
module attributes {stable_mosaic.version = 11 : i64} {
  func.func @_graph_prompt_kernel(%arg0: i32, %arg1: memref<2x16xf32, #tpu.memory_space<vmem>>, %arg2: memref<16x16xf32, #tpu.memory_space<vmem>>, %arg3: memref<16x32xf32, #tpu.memory_space<vmem>>, %arg4: memref<1x32xf32, #tpu.memory_space<vmem>>, %arg5: memref<2x32xf32, #tpu.memory_space<vmem>>, %arg6: memref<2x16xf32, #tpu.memory_space<vmem>>, %arg7: memref<2x1xf32, #tpu.memory_space<vmem>>) attributes {dimension_semantics = [#tpu.dimension_semantics<arbitrary>], iteration_bounds = array<i64: 1>, scalar_prefetch = 0 : i64, scratch_operands = 2 : i64, tpu.core_type = #tpu.core_type<tc>, window_params = [{transform_indices = @transform_0, window_bounds = array<i64: 2, 16>}, {transform_indices = @transform_1, window_bounds = array<i64: 16, 16>}, {pipeline_mode = #tpu.pipeline_mode<synchronous>, transform_indices = @transform_2, window_bounds = array<i64: 16, 32>}, {pipeline_mode = #tpu.pipeline_mode<synchronous>, transform_indices = @transform_3, window_bounds = array<i64: 1, 32>}, {pipeline_mode = #tpu.pipeline_mode<synchronous>, transform_indices = @transform_4, window_bounds = array<i64: 2, 32>}]} {
    %c0_i32 = arith.constant 0 : i32
    %0 = arith.cmpi eq, %arg0, %c0_i32 : i32
    %1 = arith.extui %0 : i1 to i32
    %c0_i32_0 = arith.constant 0 : i32
    %2 = arith.cmpi ne, %1, %c0_i32_0 : i32
    scf.if %2 {
      %cst_15 = arith.constant 0.000000e+00 : f32
      %17 = vector.broadcast %cst_15 : f32 to vector<2x16xf32>
      %c0_16 = arith.constant 0 : index
      %c0_17 = arith.constant 0 : index
      %18 = vector.load %arg6[%c0_16, %c0_17] : memref<2x16xf32, #tpu.memory_space<vmem>>, vector<2x16xf32>
      tpu.vector_store %arg6[%c0_16, %c0_17], %17 {strides = array<i32>} : memref<2x16xf32, #tpu.memory_space<vmem>>, vector<2x16xf32>,
      %cst_18 = arith.constant 0.000000e+00 : f32
      %19 = vector.broadcast %cst_18 : f32 to vector<2x1xf32>
      %c0_19 = arith.constant 0 : index
      %c0_20 = arith.constant 0 : index
      %20 = vector.load %arg7[%c0_19, %c0_20] : memref<2x1xf32, #tpu.memory_space<vmem>>, vector<2x1xf32>
      tpu.vector_store %arg7[%c0_19, %c0_20], %19 {strides = array<i32>} : memref<2x1xf32, #tpu.memory_space<vmem>>, vector<2x1xf32>,
    } else {
    }
    %c0 = arith.constant 0 : index
    %c0_1 = arith.constant 0 : index
    %3 = vector.load %arg1[%c0, %c0_1] : memref<2x16xf32, #tpu.memory_space<vmem>>, vector<2x16xf32>
    %c0_2 = arith.constant 0 : index
    %c0_3 = arith.constant 0 : index
    %4 = vector.load %arg6[%c0_2, %c0_3] : memref<2x16xf32, #tpu.memory_space<vmem>>, vector<2x16xf32>
    %c0_4 = arith.constant 0 : index
    %c0_5 = arith.constant 0 : index
    %5 = vector.load %arg2[%c0_4, %c0_5] : memref<16x16xf32, #tpu.memory_space<vmem>>, vector<16x16xf32>
    %cst = arith.constant dense<0.000000e+00> : vector<2x16xf32>
    %6 = tpu.matmul %3, %5, %cst {dimension_numbers = #tpu.dot_dimension_numbers<[1], [0], [0], [1], [0, 0, 1, 1], [], []>} : vector<2x16xf32>, vector<16x16xf32>, vector<2x16xf32> -> vector<2x16xf32>
    %7 = arith.addf %4, %6 : vector<2x16xf32>
    %c0_6 = arith.constant 0 : index
    %c0_7 = arith.constant 0 : index
    %8 = vector.load %arg6[%c0_6, %c0_7] : memref<2x16xf32, #tpu.memory_space<vmem>>, vector<2x16xf32>
    tpu.vector_store %arg6[%c0_6, %c0_7], %7 {strides = array<i32>} : memref<2x16xf32, #tpu.memory_space<vmem>>, vector<2x16xf32>,
    %c0_8 = arith.constant 0 : index
    %c0_9 = arith.constant 0 : index
    %9 = vector.load %arg7[%c0_8, %c0_9] : memref<2x1xf32, #tpu.memory_space<vmem>>, vector<2x1xf32>
    %cst_10 = arith.constant dense<0.000000e+00> : vector<2xf32>
    %10 = vector.multi_reduction <add>, %3, %cst_10 [1] : vector<2x16xf32> to vector<2xf32>
    %11 = vector.shape_cast %10 : vector<2xf32> to vector<2x1xf32>
    %12 = arith.addf %9, %11 : vector<2x1xf32>
    %c0_11 = arith.constant 0 : index
    %c0_12 = arith.constant 0 : index
    %13 = vector.load %arg7[%c0_11, %c0_12] : memref<2x1xf32, #tpu.memory_space<vmem>>, vector<2x1xf32>
    tpu.vector_store %arg7[%c0_11, %c0_12], %12 {strides = array<i32>} : memref<2x1xf32, #tpu.memory_space<vmem>>, vector<2x1xf32>,
    %c0_i32_13 = arith.constant 0 : i32
    %14 = arith.cmpi eq, %arg0, %c0_i32_13 : i32
    %15 = arith.extui %14 : i1 to i32
    %c0_i32_14 = arith.constant 0 : i32
    %16 = arith.cmpi ne, %15, %c0_i32_14 : i32
    scf.if %16 {
      %c0_15 = arith.constant 0 : index
      %c0_16 = arith.constant 0 : index
      %17 = vector.load %arg6[%c0_15, %c0_16] : memref<2x16xf32, #tpu.memory_space<vmem>>, vector<2x16xf32>
      %c0_17 = arith.constant 0 : index
      %c0_18 = arith.constant 0 : index
      %18 = vector.load %arg3[%c0_17, %c0_18] : memref<16x32xf32, #tpu.memory_space<vmem>>, vector<16x32xf32>
      %cst_19 = arith.constant dense<0.000000e+00> : vector<2x32xf32>
      %19 = tpu.matmul %17, %18, %cst_19 {dimension_numbers = #tpu.dot_dimension_numbers<[1], [0], [0], [1], [0, 0, 1, 1], [], []>} : vector<2x16xf32>, vector<16x32xf32>, vector<2x32xf32> -> vector<2x32xf32>
      %c0_20 = arith.constant 0 : index
      %c0_21 = arith.constant 0 : index
      %20 = vector.load %arg7[%c0_20, %c0_21] : memref<2x1xf32, #tpu.memory_space<vmem>>, vector<2x1xf32>
      %c0_22 = arith.constant 0 : index
      %c0_23 = arith.constant 0 : index
      %21 = vector.load %arg4[%c0_22, %c0_23] : memref<1x32xf32, #tpu.memory_space<vmem>>, vector<1x32xf32>
      %22 = vector.broadcast %20 : vector<2x1xf32> to vector<2x32xf32>
      %23 = vector.broadcast %21 : vector<1x32xf32> to vector<2x32xf32>
      %24 = arith.mulf %22, %23 : vector<2x32xf32>
      %25 = arith.addf %19, %24 : vector<2x32xf32>
      %c0_24 = arith.constant 0 : index
      %c0_25 = arith.constant 0 : index
      %26 = vector.load %arg5[%c0_24, %c0_25] : memref<2x32xf32, #tpu.memory_space<vmem>>, vector<2x32xf32>
      tpu.vector_store %arg5[%c0_24, %c0_25], %25 {strides = array<i32>} : memref<2x32xf32, #tpu.memory_space<vmem>>, vector<2x32xf32>,
    } else {
    }
    return
  }
  func.func @transform_0(%arg0: i32) -> (i32, i32) {
    %c0_i32 = arith.constant 0 : i32
    %c0_i32_0 = arith.constant 0 : i32
    return %c0_i32, %arg0 : i32, i32
  }
  func.func @transform_1(%arg0: i32) -> (i32, i32) {
    %c0_i32 = arith.constant 0 : i32
    %c0_i32_0 = arith.constant 0 : i32
    return %arg0, %c0_i32 : i32, i32
  }
  func.func @transform_2(%arg0: i32) -> (i32, i32) {
    %c0_i32 = arith.constant 0 : i32
    %c0_i32_0 = arith.constant 0 : i32
    %c0_i32_1 = arith.constant 0 : i32
    return %c0_i32, %c0_i32_0 : i32, i32
  }
  func.func @transform_3(%arg0: i32) -> (i32, i32) {
    %c0_i32 = arith.constant 0 : i32
    %c0_i32_0 = arith.constant 0 : i32
    %c0_i32_1 = arith.constant 0 : i32
    return %c0_i32, %c0_i32_0 : i32, i32
  }
  func.func @transform_4(%arg0: i32) -> (i32, i32) {
    %c0_i32 = arith.constant 0 : i32
    %c0_i32_0 = arith.constant 0 : i32
    %c0_i32_1 = arith.constant 0 : i32
    return %c0_i32, %c0_i32_0 : i32, i32
  }
}

</mosaic_0001>

<bundles_post_ra>
// kernel: tpu_custom_call.1
= control target key start
LH: loop header
LB: loop body
LE: loop exit
PB: predicated region body
PF: predicated region fallthrough
CT: control target
= control target key end

     0   :  { %9 = vsyncpa [#allocation5], 0  ;;  %s497_s0 = inlined_call_operand.hbm [shape: f32[2,16], index: 0, kind: input, shape index: {}]   ;;  %s498_s1 = inlined_call_operand.hbm [shape: f32[16,16], index: 1, kind: input, shape index: {}]   ;;  %s499_s2 = inlined_call_operand.hbm [shape: f32[16,32], index: 2, kind: input, shape index: {}]   ;;  %s500_s3 = inlined_call_operand.vmem [shape: f32[1,32], index: 3, kind: input, shape index: {}]   ;;  %s501_s4 = inlined_call_operand.hbm [shape: f32[2,32], index: 4, kind: output, shape index: {}]  }
   0x1   :  { %10 = vsyncpa [#allocation8], 0 }
   0x2   :  { %11 = vsyncpa [#allocation6], 0  ;;  %s398_s15 = smov [#allocation7]   ;;  %s304_s19 = scalar_lea.hbm %s498_s1, 256 }
   0x3   :  { %s27_s16 = sshll.u32 %s398_s15, 4  ;;  %p305_p0 = scmp.ne.s32.totalorder %s498_s1, %s304_s19  ;;  %s28_s16 = int_to_ptr.vmem [resolvable:$true] %s27_s16 }
   0x4   :  { %p308_p1 = scmp.lt.u32.totalorder %s304_s19, %s498_s1 }
   0x6   :  { %p310_p2 = pnand %p308_p1, %p305_p0 }
   0x8   :  { %313 = shalt.err (!%p310_p2)
}
   0x9   :  { %s314_s24 = scalar_lea.vmem %s28_s16, 256  ;;  %p319_p4 = scmp.lt.s32.totalorder %s28_s16, %s28_s16 }
   0xa   :  { %p315_p3 = scmp.ne.s32.totalorder %s28_s16, %s314_s24  ;;  %p320_p5 = scmp.lt.s32.totalorder %s314_s24, %s314_s24 }
   0xc   :  { %p321_p6 = por %p320_p5, %p319_p4 }
   0xe   :  { %p322_p7 = pnand %p321_p6, %p315_p3 }
  0x10   :  { %325 = shalt.err (!%p322_p7)
}
  0x11   :  { %s399_s25 = smov 128   ;;  %s400_s26 = smov 8  }
  0x12   :  { %33 = dma.hbm_to_vmem [thread:$0]  %s498_s1, 256, %s28_s16, [#allocation8], %s399_s25, %s399_s25, %s400_s26  }
  0x13   :  { %s401_s29 = smov [#allocation4]   ;;  %s402_s5 = smov [#allocation9]  }
  0x14   :  { %s18_s30 = sshll.u32 %s401_s29, 4  ;;  %s39_s6 = sshll.u32 %s402_s5, 4  ;;  %s19_s30 = int_to_ptr.vmem [resolvable:$true] %s18_s30  ;;  %s40_s6 = int_to_ptr.vmem [resolvable:$true] %s39_s6 }
  0x15   :  { %s326_s9 = scalar_lea.hbm %s497_s0, 32 }
  0x16   :  { %p327_p8 = scmp.ne.s32.totalorder %s497_s0, %s326_s9  ;;  %p330_p9 = scmp.lt.u32.totalorder %s326_s9, %s497_s0 }
  0x18   :  { %p332_p10 = pnand %p330_p9, %p327_p8 }
  0x1a   :  { %335 = shalt.err (!%p332_p10)
}
  0x1b   :  { %s336_s1 = scalar_lea.vmem %s19_s30, 32  ;;  %p341_p12 = scmp.lt.s32.totalorder %s19_s30, %s19_s30 }
  0x1c   :  { %p337_p11 = scmp.ne.s32.totalorder %s19_s30, %s336_s1  ;;  %p342_p13 = scmp.lt.s32.totalorder %s336_s1, %s336_s1 }
  0x1e   :  { %p343_p0 = por %p342_p13, %p341_p12 }
  0x20   :  { %p344_p1 = pnand %p343_p0, %p337_p11 }
  0x22   :  { %347 = shalt.err (!%p344_p1)
}
  0x23   :  { %21 = dma.hbm_to_vmem [thread:$0]  %s497_s0, 32, %s19_s30, [#allocation5]  }
  0x24   :  { %s348_s18 = scalar_lea.hbm %s499_s2, 256 }
  0x25   :  { %p349_p2 = scmp.ne.s32.totalorder %s499_s2, %s348_s18  ;;  %p352_p3 = scmp.lt.u32.totalorder %s348_s18, %s499_s2 }
  0x27   :  { %p354_p4 = pnand %p352_p3, %p349_p2 }
  0x29   :  { %357 = shalt.err (!%p354_p4)
}
  0x2a   :  { %s358_s23 = scalar_lea.vmem %s40_s6, 256  ;;  %p363_p6 = scmp.lt.s32.totalorder %s40_s6, %s40_s6 }
  0x2b   :  { %p359_p5 = scmp.ne.s32.totalorder %s40_s6, %s358_s23  ;;  %p364_p7 = scmp.lt.s32.totalorder %s358_s23, %s358_s23 }
  0x2d   :  { %p365_p8 = por %p364_p7, %p363_p6 }
  0x2f   :  { %p366_p9 = pnand %p365_p8, %p359_p5 }
  0x31   :  { %369 = shalt.err (!%p366_p9)
}
  0x32   :  { %45 = dma.hbm_to_vmem [thread:$0]  %s499_s2, 256, %s40_s6, [#allocation8], %s399_s25, %s399_s25, %s400_s26  }
  0x33   :  { %392 = dma.done.wait [#allocation5], 32  }
  0x34   :  { %393 = vsyncadd [#allocation5], 4294967264 }
  0x35   :  { %394 = dma.done.wait [#allocation8], 512  }
  0x36   :  { %395 = vsyncadd [#allocation8], 4294966784  ;;  %vm63_vm0 = vcmask 1024   ;;  %v403_v0 = vmov 0.0|0.0   ;;  %v404_v1 = vmov 0.0   ;;  %vm405_vm1 = vmmov 0  }
  0x37   :  { %287 = vmatprep.subr.bf16.mxu0 %v403_v0  ;;  %64 = vst.msk [vmem:[#allocation3] sm:$0x3] %vm63_vm0, %v404_v1  ;;  %277 = vmatprep.mubr.msk.f32.mxu0 %vm405_vm1, %v404_v1  ;;  %vm61_vm2 = vcmask 123904   ;;  %v67_v2 = vld [vmem:[#allocation7] sm:$0xff]  ;;  %v68_v3 = vld [vmem:[#allocation7 + $0x8] sm:$0xff]  ;;  %vm69_vm3 = vcmask 130048  }
  0x38   :  { %62 = vst.msk [vmem:[#allocation2] sm:$0x3] %vm61_vm2, %v404_v1  ;;  %290 = vmatprep.subr.bf16.mxu1 %v403_v0  ;;  %284 = vmatprep.mubr.msk.f32.mxu1 %vm405_vm1, %v404_v1  ;;  %v65_v4 = vld [vmem:[#allocation4] sm:$0x3]  ;;  %v288_v5 = vpack.c.bf16 %v68_v3, %v67_v2  ;;  %v157_v7 = vld [vmem:[#allocation9] sm:$0xff]  ;;  %v406_v10 = vmov 0  }
  0x39   :  { %v147_v6 = vsel %vm61_vm2, %v65_v4, 0.0  ;;  %v158_v8 = vld [vmem:[#allocation9 + $0x8] sm:$0xff]  ;;  %303 = vset.pattern.permute.xlu0 %v406_v10  ;;  %s407_s26 = smov [#allocation10]   ;;  %vm246_vm4 = vcmask 254976  }
  0x3a   :  { %148 = vadd.xlane.f32.xlu0 %v147_v6  ;;  %289 = vmatpush3.bf16.msra.mxu0 %v288_v5  ;;  %v291_v9 = vpack.c.bf16 %v158_v8, %v157_v7  ;;  %v265_v20 = vld [vmem:[%s500_s3] ss:$0 sm:$0xff]  ;;  %s254_s27 = sshll.u32 %s407_s26, 4  ;;  %s255_s27 = int_to_ptr.vmem [resolvable:$true] %s254_s27 }
  0x3b   :  { %s370_s28 = scalar_lea.vmem %s255_s27, 32  ;;  %p375_p11 = scmp.lt.s32.totalorder %s255_s27, %s255_s27 }
  0x3c   :  { %292 = vmatpush3.bf16.msra.mxu1 %v291_v9  ;;  %p371_p10 = scmp.ne.s32.totalorder %s255_s27, %s370_s28  ;;  %p376_p12 = scmp.lt.s32.totalorder %s370_s28, %s370_s28 }
  0x3d   :  { %278 = vmatmul.mubr.msk.f32.vlgmr.msra.gmra.mrb[0].mxu0 %vm69_vm3, %v65_v4 }
  0x3e   :  { %v146_v11 = vld [vmem:[#allocation3] sm:$0x3]  ;;  %p377_p13 = por %p376_p12, %p375_p11 }
  0x3f   :  { %v66_v15 = vld [vmem:[#allocation2] sm:$0x3] }
  0x40   :  { %p378_p0 = pnand %p377_p13, %p371_p10 }
  0xc7   :  { %v149_v12 = vpop.xlane.xlu0 %148 }
  0xc8   :  { %v150_v13 = vadd.f32 %v149_v12, %v146_v11 }
  0xca   :  { %152 = vst.msk [vmem:[#allocation3] sm:$0x3] %vm63_vm0, %v150_v13 }
  0xd1   :  { %v159_v14 = vld [vmem:[#allocation3] sm:$0x3] }
  0xd2   :  { %163 = vperm.xlu0 %303, %v159_v14  }
 0x110   :  { %v139_v16 = vpop.f32.mrb[0].mxu0 }
 0x111   :  { %v143_v17 = vadd.f32 %v139_v16, %v66_v15  ;;  %v279_v18 = vpop.f32.mrb[1].mxu0 }
 0x113   :  { %145 = vst.msk [vmem:[#allocation2] sm:$0x3] %vm61_vm2, %v143_v17 }
 0x11a   :  { %v156_v19 = vld [vmem:[#allocation2] sm:$0x3] }
 0x11b   :  { %285 = vmatmul.mubr.msk.f32.vlgmr.msra.gmra.mrb[0].mxu1 %vm69_vm3, %v156_v19 }
 0x151   :  { %v164_v21 = vpop.permute.xlu0 %163 }
 0x152   :  { %v172_v22 = vmul.f32 %v265_v20, %v164_v21 }
 0x1ee   :  { %v242_v23 = vpop.f32.mrb[0].mxu1 }
 0x1ef   :  { %v243_v24 = vadd.f32 %v242_v23, %v172_v22  ;;  %v286_v25 = vpop.f32.mrb[1].mxu1 }
 0x1f1   :  { %247 = vst.msk [vmem:[#allocation10] sm:$0x3] %vm246_vm4, %v243_v24 }
 0x1f2   :  { %381 = shalt.err (!%p378_p0)
}
 0x1f3   :  { %s382_s3 = scalar_lea.hbm %s501_s4, 32 }
 0x1f4   :  { %p383_p1 = scmp.ne.s32.totalorder %s501_s4, %s382_s3  ;;  %p386_p2 = scmp.lt.u32.totalorder %s382_s3, %s501_s4 }
 0x1f6   :  { %p388_p3 = pnand %p386_p2, %p383_p1 }
 0x1f8   :  { %391 = shalt.err (!%p388_p3)
}
 0x1f9   :  { %257 = dma.vmem_to_hbm [thread:$0]  %s255_s27, 32, %s501_s4, [#allocation6]  }
 0x1fa   :  { %396 = dma.done.wait [#allocation6], 32  }
 0x1fb   :  { %397 = vsyncadd [#allocation6], 4294967264 }
 0x1fc   :  { %261 = vsyncpa [#allocation5], 1 }
 0x1fd   :  { %262 = vsyncpa [#allocation8], 1 }
 0x1fe   :  { %263 = vsyncpa [#allocation6], 1 }

</bundles_post_ra>
